<compile_context>
chip_gen: v7x
topology: tpu7x:2x2x1
jax: 0.10.0
libtpu: 0.0.40
codegen_flags: <defaults>
</compile_context>

<pallas_src>
import math

import jax
import jax.numpy as jnp
import numpy as np
from jax import lax
from jax.experimental import pallas as pl
from jax.experimental.pallas import tpu as pltpu


# --------------------------------------------------------------------------- kernel

def _pixel_shuffle_r2_kernel(x_ref, o_ref):
    """PixelShuffle(2) for a group of G flattened (batch, out-channel) pairs.

    x_ref: (G, 4, H, W)   -- the 4 input channels feeding each output channel
    o_ref: (G*H, 4W)      -- lane-dense slab; lanes = [even row 2W | odd row 2W]

    out[g*H + h, 2*w + (c & 1) + 2*W*(c >> 1)] = x[g, c, h, w]
    """
    g, _, h, w = x_ref.shape
    comp_dt = jnp.bfloat16 if o_ref.dtype == jnp.bfloat16 else jnp.float32

    # 0/1 lane-dilation matrices built from iotas (no HBM input, no double buffering).
    two_k = 2 * lax.broadcasted_iota(jnp.int32, (w, 4 * w), 0)   # 2 * source column
    lane = lax.broadcasted_iota(jnp.int32, (w, 4 * w), 1)        # destination lane

    x = x_ref[...]
    acc = None
    for c in range(4):
        # channel c lands at lane 2*w_idx + (c & 1) + 2*W*(c >> 1)
        p_c = (lane == two_k + (c & 1) + 2 * w * (c >> 1)).astype(comp_dt)
        x_c = x[:, c].reshape(g * h, w).astype(comp_dt)
        term = jnp.dot(x_c, p_c, preferred_element_type=comp_dt)
        acc = term if acc is None else acc + term
    o_ref[...] = acc.astype(o_ref.dtype)


# --------------------------------------------------------------------- sizing helpers

def _vmem_limit_bytes():
    """Explicit scoped-VMEM limit, generation aware (v7x has only 64 MiB per TC)."""
    cap = 64 << 20  # conservative default = v7x per-TensorCore VMEM
    try:
        info = pltpu.get_tpu_info()
        cap = int(getattr(info, "vmem_capacity_bytes", cap)) or cap
    except Exception:
        pass
    limit = min(cap * 3 // 4, 96 << 20)
    if _is_dual_core_chip():
        limit = min(limit, 48 << 20)
    return int(limit)


def _is_dual_core_chip():
    """Best-effort detection of dual-TensorCore (v7x-class) chips."""
    try:
        kind = jax.devices()[0].device_kind.lower()
        return ("v7" in kind) or ("7x" in kind)
    except Exception:
        return False


def _padded_plane_bytes(rows, cols, dtype):
    """Bytes of one (rows, cols) plane after (8,128)/(16,128)/(32,128) tile padding."""
    itemsize = jnp.dtype(dtype).itemsize
    sub = 8 * max(1, 4 // itemsize)          # 8 for f32, 16 for bf16, 32 for int8
    return pl.cdiv(rows, sub) * sub * pl.cdiv(cols, 128) * 128 * itemsize


def _pick_group(nc, h, w, dtype, vmem_limit):
    """Largest group size G whose padded, double-buffered working set fits in VMEM."""
    in_bytes = 4 * _padded_plane_bytes(h, w, dtype)          # (4, H, W) per group row
    out_bytes = _padded_plane_bytes(h, 4 * w, dtype)         # (H, 4W)  per group row
    per_group = in_bytes + out_bytes
    # ~ vmem_limit >= 2*(in+out) [double buffering] + acc (~out) + margin
    target = max(per_group, (vmem_limit - (4 << 20)) // 3)
    g = max(1, min(nc, target // per_group))

    # Dual-TC chips (v7x): prefer >=2 and an even number of grid steps for balanced shards.
    if _is_dual_core_chip() and nc >= 2:
        steps = pl.cdiv(nc, g)
        if steps < 2:
            steps = 2
        elif steps % 2:
            steps += 1
        g = max(1, pl.cdiv(nc, steps))
    return int(g)


# -------------------------------------------------------------------------- wrappers

def pixel_shuffle_r2(x_nchw, group=None):
    """PixelShuffle(upscale_factor=2) on an NCHW array via a Pallas TPU kernel."""
    n, c4, h, w = x_nchw.shape
    assert c4 % 4 == 0, "channel dim must be divisible by upscale_factor**2 = 4"
    c_out = c4 // 4
    nc = n * c_out

    x_grp = x_nchw.reshape(nc, 4, h, w)                      # free glue reshape

    vmem_limit = _vmem_limit_bytes()
    g = group if group is not None else _pick_group(nc, h, w, x_nchw.dtype, vmem_limit)
    g = max(1, min(int(g), nc))
    steps = pl.cdiv(nc, g)                                   # clipped last block if ragged

    itemsize = jnp.dtype(x_nchw.dtype).itemsize
    cost = pl.CostEstimate(
        flops=32 * nc * h * w * w,                           # 4 dots of (NC*H,W)@(W,4W)
        transcendentals=0,
        bytes_accessed=2 * nc * 4 * h * w * itemsize,        # read + write, mem-bound
    )

    out2d = pl.pallas_call(
        _pixel_shuffle_r2_kernel,
        out_shape=jax.ShapeDtypeStruct((nc * h, 4 * w), x_nchw.dtype),
        grid_spec=pltpu.PrefetchScalarGridSpec(
            num_scalar_prefetch=0,
            grid=(steps,),
            in_specs=[pl.BlockSpec((g, 4, h, w), lambda i: (i, 0, 0, 0))],
            out_specs=pl.BlockSpec((g * h, 4 * w), lambda i: (i, 0)),
        ),
        compiler_params=pltpu.CompilerParams(
            dimension_semantics=("parallel",),
            vmem_limit_bytes=vmem_limit,
        ),
        cost_estimate=cost,
    )(x_grp)

    # (NC*H, 4W) -> (N, C_out, 2H, 2W): purely contiguous (free) reshape,
    # row = (nc_idx, h), lane = parity*2W + col  ->  (n, c_out, 2h + parity, col).
    return out2d.reshape(n, c_out, 2 * h, 2 * w)


def upsampling_forward(x):
    """JAX/Pallas equivalent of Upsampling.forward; input x has shape (B, L, C)."""
    _, l, c = x.shape
    re_size = math.isqrt(l // 2)
    assert 2 * re_size * re_size == l, "L must equal 2 * re_size**2"
    assert re_size % 4 == 0, "re_size (PixelShuffle channel dim) must be divisible by 4"
    assert c % 4 == 0, "C must be divisible by 4"
    re_ch = c // 4
    # Same as torch.reshape(x, (-1, re_size, re_size*2, re_ch)) — pure glue reshape.
    x4 = jnp.reshape(x, (-1, re_size, re_size * 2, re_ch))
    return pixel_shuffle_r2(x4)


# ------------------------------------------------------------------------- reference

def _pixel_shuffle_reference(x4):
    n, c4, h, w = x4.shape
    co = c4 // 4
    y = x4.reshape(n, co, 2, 2, h, w)
    y = jnp.transpose(y, (0, 1, 4, 2, 5, 3))
    return y.reshape(n, co, 2 * h, 2 * w)


def upsampling_reference(x):
    _, l, c = x.shape
    re_size = math.isqrt(l // 2)
    re_ch = c // 4
    x4 = jnp.reshape(x, (-1, re_size, re_size * 2, re_ch))
    return _pixel_shuffle_reference(x4)


# ------------------------------------------------------------------------------ main

if __name__ == "__main__":
    key = jax.random.PRNGKey(0)

    cases = [
        # (B, L, C), dtype
        ((2, 32, 16), jnp.float32),    # re_size=4, re_ch=4  -> NCHW (8,4,8,4)   -> out (8,1,16,8)
        ((2, 128, 32), jnp.float32),   # re_size=8, re_ch=8  -> NCHW (8,8,16,8)  -> out (8,2,32,16)
        ((2, 128, 64), jnp.bfloat16),  # bf16 stays bf16 through the MXU (exact 0/1 selection)
    ]
    fwd = jax.jit(upsampling_forward)
    for shape, dtype in cases:
        key, sub = jax.random.split(key)
        x = jax.random.normal(sub, shape, dtype=jnp.float32).astype(dtype)
        out = jax.block_until_ready(fwd(x))
        ref = upsampling_reference(x)
        assert out.shape == ref.shape, (out.shape, ref.shape)
        tol = 1e-6 if dtype == jnp.float32 else 1e-2
        np.testing.assert_allclose(
            np.asarray(out, dtype=np.float32),
            np.asarray(ref, dtype=np.float32),
            rtol=tol, atol=tol,
        )

    # Clipped-tail path: NC (=8) not divisible by the group size (=3) -> cdiv grid,
    # last block reads are padded and its out-of-range writes are masked.
    key, sub = jax.random.split(key)
    x4 = jax.random.normal(sub, (2, 16, 8, 4), dtype=jnp.float32)
    out = jax.block_until_ready(pixel_shuffle_r2(x4, group=3))
    ref = _pixel_shuffle_reference(x4)
    np.testing.assert_allclose(np.asarray(out), np.asarray(ref), rtol=1e-6, atol=1e-6)

    print("KERNEL_OK")
</pallas_src>

<mosaic_0001>
module attributes {stable_mosaic.version = 11 : i64} {
  func.func @_pixel_shuffle_r2_kernel(%arg0: i32, %arg1: memref<8x4x8x4xf32, #tpu.memory_space<vmem>>, %arg2: memref<64x16xf32, #tpu.memory_space<vmem>>) attributes {dimension_semantics = [#tpu.dimension_semantics<parallel>], iteration_bounds = array<i64: 1>, scalar_prefetch = 0 : i64, scratch_operands = 0 : i64, tpu.core_type = #tpu.core_type<tc>, window_params = [{transform_indices = @transform_0, window_bounds = array<i64: 8, 4, 8, 4>}, {transform_indices = @transform_1, window_bounds = array<i64: 64, 16>}]} {
    %0 = tpu.iota {dimensions = array<i32: 0>} : vector<4x16xi32>
    %c2_i32 = arith.constant 2 : i32
    %1 = vector.broadcast %c2_i32 : i32 to vector<4x16xi32>
    %2 = arith.muli %1, %0 : vector<4x16xi32>
    %3 = tpu.iota {dimensions = array<i32: 1>} : vector<4x16xi32>
    %c0 = arith.constant 0 : index
    %c0_0 = arith.constant 0 : index
    %c0_1 = arith.constant 0 : index
    %c0_2 = arith.constant 0 : index
    %4 = vector.load %arg1[%c0, %c0_0, %c0_1, %c0_2] : memref<8x4x8x4xf32, #tpu.memory_space<vmem>>, vector<8x4x8x4xf32>
    %c0_i32 = arith.constant 0 : i32
    %5 = vector.broadcast %c0_i32 : i32 to vector<4x16xi32>
    %6 = arith.addi %2, %5 : vector<4x16xi32>
    %c0_i32_3 = arith.constant 0 : i32
    %7 = vector.broadcast %c0_i32_3 : i32 to vector<4x16xi32>
    %8 = arith.addi %6, %7 : vector<4x16xi32>
    %9 = arith.cmpi eq, %3, %8 : vector<4x16xi32>
    %10 = arith.extui %9 : vector<4x16xi1> to vector<4x16xi32>
    %11 = arith.sitofp %10 : vector<4x16xi32> to vector<4x16xf32>
    %12 = vector.extract_strided_slice %4 {offsets = [0, 0, 0, 0], sizes = [8, 1, 8, 4], strides = [1, 1, 1, 1]} : vector<8x4x8x4xf32> to vector<8x1x8x4xf32>
    %13 = vector.shape_cast %12 : vector<8x1x8x4xf32> to vector<8x8x4xf32>
    %14 = vector.shape_cast %13 : vector<8x8x4xf32> to vector<64x4xf32>
    %cst = arith.constant dense<0.000000e+00> : vector<64x16xf32>
    %15 = tpu.matmul %14, %11, %cst {dimension_numbers = #tpu.dot_dimension_numbers<[1], [0], [0], [1], [0, 0, 1, 1], [], []>} : vector<64x4xf32>, vector<4x16xf32>, vector<64x16xf32> -> vector<64x16xf32>
    %c1_i32 = arith.constant 1 : i32
    %16 = vector.broadcast %c1_i32 : i32 to vector<4x16xi32>
    %17 = arith.addi %2, %16 : vector<4x16xi32>
    %c0_i32_4 = arith.constant 0 : i32
    %18 = vector.broadcast %c0_i32_4 : i32 to vector<4x16xi32>
    %19 = arith.addi %17, %18 : vector<4x16xi32>
    %20 = arith.cmpi eq, %3, %19 : vector<4x16xi32>
    %21 = arith.extui %20 : vector<4x16xi1> to vector<4x16xi32>
    %22 = arith.sitofp %21 : vector<4x16xi32> to vector<4x16xf32>
    %23 = vector.extract_strided_slice %4 {offsets = [0, 1, 0, 0], sizes = [8, 1, 8, 4], strides = [1, 1, 1, 1]} : vector<8x4x8x4xf32> to vector<8x1x8x4xf32>
    %24 = vector.shape_cast %23 : vector<8x1x8x4xf32> to vector<8x8x4xf32>
    %25 = vector.shape_cast %24 : vector<8x8x4xf32> to vector<64x4xf32>
    %cst_5 = arith.constant dense<0.000000e+00> : vector<64x16xf32>
    %26 = tpu.matmul %25, %22, %cst_5 {dimension_numbers = #tpu.dot_dimension_numbers<[1], [0], [0], [1], [0, 0, 1, 1], [], []>} : vector<64x4xf32>, vector<4x16xf32>, vector<64x16xf32> -> vector<64x16xf32>
    %27 = arith.addf %15, %26 : vector<64x16xf32>
    %c0_i32_6 = arith.constant 0 : i32
    %28 = vector.broadcast %c0_i32_6 : i32 to vector<4x16xi32>
    %29 = arith.addi %2, %28 : vector<4x16xi32>
    %c8_i32 = arith.constant 8 : i32
    %30 = vector.broadcast %c8_i32 : i32 to vector<4x16xi32>
    %31 = arith.addi %29, %30 : vector<4x16xi32>
    %32 = arith.cmpi eq, %3, %31 : vector<4x16xi32>
    %33 = arith.extui %32 : vector<4x16xi1> to vector<4x16xi32>
    %34 = arith.sitofp %33 : vector<4x16xi32> to vector<4x16xf32>
    %35 = vector.extract_strided_slice %4 {offsets = [0, 2, 0, 0], sizes = [8, 1, 8, 4], strides = [1, 1, 1, 1]} : vector<8x4x8x4xf32> to vector<8x1x8x4xf32>
    %36 = vector.shape_cast %35 : vector<8x1x8x4xf32> to vector<8x8x4xf32>
    %37 = vector.shape_cast %36 : vector<8x8x4xf32> to vector<64x4xf32>
    %cst_7 = arith.constant dense<0.000000e+00> : vector<64x16xf32>
    %38 = tpu.matmul %37, %34, %cst_7 {dimension_numbers = #tpu.dot_dimension_numbers<[1], [0], [0], [1], [0, 0, 1, 1], [], []>} : vector<64x4xf32>, vector<4x16xf32>, vector<64x16xf32> -> vector<64x16xf32>
    %39 = arith.addf %27, %38 : vector<64x16xf32>
    %c1_i32_8 = arith.constant 1 : i32
    %40 = vector.broadcast %c1_i32_8 : i32 to vector<4x16xi32>
    %41 = arith.addi %2, %40 : vector<4x16xi32>
    %c8_i32_9 = arith.constant 8 : i32
    %42 = vector.broadcast %c8_i32_9 : i32 to vector<4x16xi32>
    %43 = arith.addi %41, %42 : vector<4x16xi32>
    %44 = arith.cmpi eq, %3, %43 : vector<4x16xi32>
    %45 = arith.extui %44 : vector<4x16xi1> to vector<4x16xi32>
    %46 = arith.sitofp %45 : vector<4x16xi32> to vector<4x16xf32>
    %47 = vector.extract_strided_slice %4 {offsets = [0, 3, 0, 0], sizes = [8, 1, 8, 4], strides = [1, 1, 1, 1]} : vector<8x4x8x4xf32> to vector<8x1x8x4xf32>
    %48 = vector.shape_cast %47 : vector<8x1x8x4xf32> to vector<8x8x4xf32>
    %49 = vector.shape_cast %48 : vector<8x8x4xf32> to vector<64x4xf32>
    %cst_10 = arith.constant dense<0.000000e+00> : vector<64x16xf32>
    %50 = tpu.matmul %49, %46, %cst_10 {dimension_numbers = #tpu.dot_dimension_numbers<[1], [0], [0], [1], [0, 0, 1, 1], [], []>} : vector<64x4xf32>, vector<4x16xf32>, vector<64x16xf32> -> vector<64x16xf32>
    %51 = arith.addf %39, %50 : vector<64x16xf32>
    %c0_11 = arith.constant 0 : index
    %c0_12 = arith.constant 0 : index
    %52 = vector.load %arg2[%c0_11, %c0_12] : memref<64x16xf32, #tpu.memory_space<vmem>>, vector<64x16xf32>
    tpu.vector_store %arg2[%c0_11, %c0_12], %51 {strides = array<i32>} : memref<64x16xf32, #tpu.memory_space<vmem>>, vector<64x16xf32>,
    return
  }
  func.func @transform_0(%arg0: i32) -> (i32, i32, i32, i32) {
    %c0_i32 = arith.constant 0 : i32
    %c0_i32_0 = arith.constant 0 : i32
    %c0_i32_1 = arith.constant 0 : i32
    %c0_i32_2 = arith.constant 0 : i32
    return %arg0, %c0_i32, %c0_i32_0, %c0_i32_1 : i32, i32, i32, i32
  }
  func.func @transform_1(%arg0: i32) -> (i32, i32) {
    %c0_i32 = arith.constant 0 : i32
    %c0_i32_0 = arith.constant 0 : i32
    return %arg0, %c0_i32 : i32, i32
  }
}

</mosaic_0001>

<bundles_post_ra>
// kernel: upsampling_forward.1
= control target key start
LH: loop header
LB: loop body
LE: loop exit
PB: predicated region body
PF: predicated region fallthrough
CT: control target
= control target key end

     0   :  { %v8_v0 = vlaneseq  ;;  %vm52_vm0 = vcmask 31744   ;;  %vm77_vm2 = vcmask 1043456   ;;  %v776_v9 = vmov 0.0   ;;  %s955_s0 = inlined_call_operand.vmem [shape: f32[8,4,8,4], index: 0, kind: input, shape index: {}]   ;;  %s956_s1 = inlined_call_operand.vmem [shape: f32[64,16], index: 1, kind: output, shape index: {}]  }
   0x1   :  { %v14_v1 = vld [vmem:[%s955_s0 + $0x8] sm:$0xff]  ;;  %v15_v2 = vld [vmem:[%s955_s0 + $0x10] sm:$0xff]  ;;  %v13_v28 = vld [vmem:[%s955_s0] sm:$0xff]  ;;  %vm606_vm6 = vcmask 130048  }
   0x2   :  { %v9_v3 = vshrl.u32 %v8_v0, 7  ;;  %697 = vmatprep.mubr.msk.f32.mxu1 %vm52_vm0, %v14_v1  ;;  %725 = vmatprep.mubr.msk.f32.mxu0 %vm52_vm0, %v15_v2  ;;  %v12_v5 = vand.u32 127, %v8_v0  ;;  %v18_v12 = vld [vmem:[%s955_s0 + $0x28] sm:$0xff]  ;;  %v19_v14 = vld [vmem:[%s955_s0 + $0x30] sm:$0xff]  ;;  %v16_v29 = vld [vmem:[%s955_s0 + $0x18] sm:$0xff] }
   0x3   :  { %v22_v16 = vld [vmem:[%s955_s0 + $0x48] sm:$0xff]  ;;  %v23_v17 = vld [vmem:[%s955_s0 + $0x50] sm:$0xff]  ;;  %v17_v30 = vld [vmem:[%s955_s0 + $0x20] sm:$0xff] }
   0x4   :  { %v10_v4 = vmul.u32 2, %v9_v3  ;;  %v26_v18 = vld [vmem:[%s955_s0 + $0x68] sm:$0xff]  ;;  %v27_v19 = vld [vmem:[%s955_s0 + $0x70] sm:$0xff]  ;;  %v20_v31 = vld [vmem:[%s955_s0 + $0x38] sm:$0xff] }
   0x5   :  { %v30_v20 = vld [vmem:[%s955_s0 + $0x88] sm:$0xff]  ;;  %v31_v21 = vld [vmem:[%s955_s0 + $0x90] sm:$0xff]  ;;  %v21_v32 = vld [vmem:[%s955_s0 + $0x40] sm:$0xff] }
   0x6   :  { %v48_v6 = vadd.s32 1, %v10_v4  ;;  %v318_v7 = vadd.s32 8, %v10_v4  ;;  %vm45_vm1 = vcmp.eq.s32.totalorder %v12_v5, %v10_v4  ;;  %v34_v22 = vld [vmem:[%s955_s0 + $0xa8] sm:$0xff]  ;;  %v35_v23 = vld [vmem:[%s955_s0 + $0xb0] sm:$0xff]  ;;  %v24_v33 = vld [vmem:[%s955_s0 + $0x58] sm:$0xff] }
   0x7   :  { %v619_v13 = vsel %vm45_vm1, 1.0, %v776_v9  ;;  %v38_v24 = vld [vmem:[%s955_s0 + $0xc8] sm:$0xff]  ;;  %v39_v25 = vld [vmem:[%s955_s0 + $0xd0] sm:$0xff]  ;;  %v25_v34 = vld [vmem:[%s955_s0 + $0x60] sm:$0xff] }
   0x8   :  { %vm49_vm3 = vcmp.eq.s32.totalorder %v12_v5, %v48_v6  ;;  %v462_v8 = vadd.s32 8, %v48_v6  ;;  %vm319_vm4 = vcmp.eq.s32.totalorder %v12_v5, %v318_v7  ;;  %v42_v26 = vld [vmem:[%s955_s0 + $0xe8] sm:$0xff]  ;;  %v43_v27 = vld [vmem:[%s955_s0 + $0xf0] sm:$0xff]  ;;  %v28_v35 = vld [vmem:[%s955_s0 + $0x78] sm:$0xff] }
   0x9   :  { %v620_v10 = vsel %vm49_vm3, 1.0, %v776_v9  ;;  %v639_v11 = vsel %vm319_vm4, 1.0, %v776_v9  ;;  %v29_v36 = vld [vmem:[%s955_s0 + $0x80] sm:$0xff]  ;;  %v32_v37 = vld [vmem:[%s955_s0 + $0x98] sm:$0xff] }
   0xa   :  { %695 = vmatprep.subr.msk.mxu1 %vm77_vm2, %v620_v10  ;;  %723 = vmatprep.subr.msk.mxu0 %vm77_vm2, %v639_v11  ;;  %vm463_vm5 = vcmp.eq.s32.totalorder %v12_v5, %v462_v8  ;;  %v33_v38 = vld [vmem:[%s955_s0 + $0xa0] sm:$0xff]  ;;  %v36_v39 = vld [vmem:[%s955_s0 + $0xb8] sm:$0xff] }
   0xb   :  { %696 = vmatpush3.msk.msra.mxu1 %vm77_vm2, %v620_v10  ;;  %724 = vmatpush3.msk.msra.mxu0 %vm77_vm2, %v639_v11  ;;  %v649_v15 = vsel %vm463_vm5, 1.0, %v776_v9  ;;  %v37_v40 = vld [vmem:[%s955_s0 + $0xc0] sm:$0xff]  ;;  %v40_v41 = vld [vmem:[%s955_s0 + $0xd8] sm:$0xff] }
   0xc   :  { %698 = vmatmul.mubr.msk.f32.vlgmr.msra.gmra.mrb[0].mxu1 %vm52_vm0, %v18_v12  ;;  %709 = vmatprep.subr.msk.mxu1 %vm77_vm2, %v619_v13  ;;  %v41_v42 = vld [vmem:[%s955_s0 + $0xe0] sm:$0xff]  ;;  %v44_v43 = vld [vmem:[%s955_s0 + $0xf8] sm:$0xff] }
   0xd   :  { %726 = vmatmul.mubr.msk.f32.vlgmr.msra.gmra.mrb[0].mxu0 %vm52_vm0, %v19_v14  ;;  %737 = vmatprep.subr.msk.mxu0 %vm77_vm2, %v649_v15 }
   0xe   :  { %710 = vmatpush3.msk.msra.mxu1 %vm77_vm2, %v619_v13  ;;  %738 = vmatpush3.msk.msra.mxu0 %vm77_vm2, %v649_v15 }
   0xf   :  { %700 = vmatprep.mubr.msk.f32.mxu1 %vm52_vm0, %v22_v16  ;;  %728 = vmatprep.mubr.msk.f32.mxu0 %vm52_vm0, %v23_v17 }
  0x10   :  { %701 = vmatmul.mubr.msk.f32.gmra.mrb[2].mxu1 %vm52_vm0, %v26_v18 }
  0x11   :  { %729 = vmatmul.mubr.msk.f32.gmra.mrb[2].mxu0 %vm52_vm0, %v27_v19  ;;  %703 = vmatprep.mubr.msk.f32.mxu1 %vm52_vm0, %v30_v20 }
  0x12   :  { %731 = vmatprep.mubr.msk.f32.mxu0 %vm52_vm0, %v31_v21 }
  0x14   :  { %704 = vmatmul.mubr.msk.f32.gmra.mrb[4].mxu1 %vm52_vm0, %v34_v22 }
  0x15   :  { %732 = vmatmul.mubr.msk.f32.gmra.mrb[4].mxu0 %vm52_vm0, %v35_v23  ;;  %706 = vmatprep.mubr.msk.f32.mxu1 %vm52_vm0, %v38_v24 }
  0x16   :  { %734 = vmatprep.mubr.msk.f32.mxu0 %vm52_vm0, %v39_v25 }
  0x18   :  { %707 = vmatmul.mubr.msk.f32.gmra.mrb[6].mxu1 %vm52_vm0, %v42_v26 }
  0x19   :  { %735 = vmatmul.mubr.msk.f32.gmra.mrb[6].mxu0 %vm52_vm0, %v43_v27  ;;  %711 = vmatprep.mubr.msk.f32.mxu1 %vm52_vm0, %v13_v28 }
  0x1a   :  { %739 = vmatprep.mubr.msk.f32.mxu0 %vm52_vm0, %v16_v29 }
  0x1c   :  { %712 = vmatmul.mubr.msk.f32.vlgmr.msra.gmra.mrb[0].mxu1 %vm52_vm0, %v17_v30 }
  0x1d   :  { %740 = vmatmul.mubr.msk.f32.vlgmr.msra.gmra.mrb[0].mxu0 %vm52_vm0, %v20_v31  ;;  %714 = vmatprep.mubr.msk.f32.mxu1 %vm52_vm0, %v21_v32 }
  0x1e   :  { %742 = vmatprep.mubr.msk.f32.mxu0 %vm52_vm0, %v24_v33 }
  0x20   :  { %715 = vmatmul.mubr.msk.f32.gmra.mrb[2].mxu1 %vm52_vm0, %v25_v34 }
  0x21   :  { %743 = vmatmul.mubr.msk.f32.gmra.mrb[2].mxu0 %vm52_vm0, %v28_v35  ;;  %717 = vmatprep.mubr.msk.f32.mxu1 %vm52_vm0, %v29_v36 }
  0x22   :  { %745 = vmatprep.mubr.msk.f32.mxu0 %vm52_vm0, %v32_v37 }
  0x24   :  { %718 = vmatmul.mubr.msk.f32.gmra.mrb[4].mxu1 %vm52_vm0, %v33_v38 }
  0x25   :  { %746 = vmatmul.mubr.msk.f32.gmra.mrb[4].mxu0 %vm52_vm0, %v36_v39  ;;  %720 = vmatprep.mubr.msk.f32.mxu1 %vm52_vm0, %v37_v40 }
  0x26   :  { %748 = vmatprep.mubr.msk.f32.mxu0 %vm52_vm0, %v40_v41 }
  0x28   :  { %721 = vmatmul.mubr.msk.f32.gmra.mrb[6].mxu1 %vm52_vm0, %v41_v42 }
  0x29   :  { %749 = vmatmul.mubr.msk.f32.gmra.mrb[6].mxu0 %vm52_vm0, %v44_v43 }
  0xef   :  { %v713_v44 = vpop.f32.mrb[0].mxu1 }
  0xf0   :  { %v741_v45 = vpop.f32.mrb[0].mxu0  ;;  %v279_v46 = vpop.f32.mrb[1].mxu1 }
  0xf1   :  { %v751_v47 = vadd.f32 %v741_v45, %v713_v44  ;;  %v559_v48 = vpop.f32.mrb[1].mxu0 }
  0xf2   :  { %v752_v49 = vadd.f32 %v559_v48, %v279_v46 }
  0xf3   :  { %608 = vst.msk [vmem:[%s956_s1 + $0x8] sm:$0xff] %vm606_vm6, %v751_v47  ;;  %v716_v50 = vpop.f32.mrb[2].mxu1 }
  0xf4   :  { %607 = vst.msk [vmem:[%s956_s1] sm:$0xff] %vm606_vm6, %v752_v49  ;;  %v744_v51 = vpop.f32.mrb[2].mxu0  ;;  %v289_v52 = vpop.f32.mrb[3].mxu1 }
  0xf5   :  { %v753_v53 = vadd.f32 %v744_v51, %v716_v50  ;;  %v569_v54 = vpop.f32.mrb[3].mxu0 }
  0xf6   :  { %v754_v55 = vadd.f32 %v569_v54, %v289_v52 }
  0xf7   :  { %610 = vst.msk [vmem:[%s956_s1 + $0x18] sm:$0xff] %vm606_vm6, %v753_v53  ;;  %v719_v56 = vpop.f32.mrb[4].mxu1 }
  0xf8   :  { %609 = vst.msk [vmem:[%s956_s1 + $0x10] sm:$0xff] %vm606_vm6, %v754_v55  ;;  %v747_v57 = vpop.f32.mrb[4].mxu0  ;;  %v299_v58 = vpop.f32.mrb[5].mxu1 }
  0xf9   :  { %v755_v59 = vadd.f32 %v747_v57, %v719_v56  ;;  %v579_v60 = vpop.f32.mrb[5].mxu0 }
  0xfa   :  { %v756_v61 = vadd.f32 %v579_v60, %v299_v58 }
  0xfb   :  { %612 = vst.msk [vmem:[%s956_s1 + $0x28] sm:$0xff] %vm606_vm6, %v755_v59  ;;  %v722_v62 = vpop.f32.mrb[6].mxu1 }
  0xfc   :  { %611 = vst.msk [vmem:[%s956_s1 + $0x20] sm:$0xff] %vm606_vm6, %v756_v61  ;;  %v750_v63 = vpop.f32.mrb[6].mxu0  ;;  %v309_v0 = vpop.f32.mrb[7].mxu1 }
  0xfd   :  { %v757_v1 = vadd.f32 %v750_v63, %v722_v62  ;;  %v589_v2 = vpop.f32.mrb[7].mxu0 }
  0xfe   :  { %v758_v3 = vadd.f32 %v589_v2, %v309_v0 }
  0xff   :  { %614 = vst.msk [vmem:[%s956_s1 + $0x38] sm:$0xff] %vm606_vm6, %v757_v1 }
 0x100   :  { %613 = vst.msk [vmem:[%s956_s1 + $0x30] sm:$0xff] %vm606_vm6, %v758_v3 }

</bundles_post_ra>
